<compile_context>
chip_gen: v6e
topology: v6e:2x2x1
jax: 0.10.0
libtpu: 0.0.40
codegen_flags: <defaults>
</compile_context>

<pallas_src>
import functools

import jax
import jax.numpy as jnp
from jax import lax
from jax.experimental import pallas as pl
from jax.experimental.pallas import tpu as pltpu


# ---------------------------------------------------------------------------
# Fused kernel: one batch-block per grid point -> QKV + attention (all heads) + proj
# ---------------------------------------------------------------------------
def mha_fused_kernel(x_ref, wqkv_ref, wproj_ref, bproj_ref, o_ref, *,
                     num_heads, head_size, seq_len, batch_block):
    # x_ref:     (batch_block*T, C)  bf16  flattened token rows
    # wqkv_ref:  (C, Npad)           bf16  [Q heads | K heads | V heads | zero pad]
    #                                      (1/sqrt(D) folded into Q columns)
    # wproj_ref: (H*D, C)            bf16  transposed nn.Linear weight
    # bproj_ref: (1, C)              f32
    # o_ref:     (batch_block*T, C)  f32
    H, D, T, BB = num_heads, head_size, seq_len, batch_block
    HD = H * D

    # One lane-dense MXU matmul producing Q, K, V for every head of every token row in
    # the block: bf16 operands, f32 accumulation.
    qkv = jnp.dot(x_ref[...], wqkv_ref[...],
                  preferred_element_type=jnp.float32)            # (BB*T, Npad) f32
    qkv_bf = qkv.astype(jnp.bfloat16)                            # score/AV matmul operands

    # Causal mask built once per grid step; finite fill avoids inf-inf NaN hazards and the
    # diagonal is always unmasked so row sums never vanish.
    row = lax.broadcasted_iota(jnp.int32, (T, T), 0)
    col = lax.broadcasted_iota(jnp.int32, (T, T), 1)
    causal = col <= row
    neg_big = jnp.float32(-1e30)

    # TODO(synk): flash-style KV tiling with online softmax belongs here for realistic T;
    # at T=8 the full (T,T) score block is a fraction of one vreg tile.
    blk_outs = []
    for b in range(BB):                          # static unroll: BB and H are small
        r0 = b * T
        head_outs = []
        for h in range(H):
            q = qkv_bf[r0:r0 + T, h * D:(h + 1) * D]                      # (T, D)
            k = qkv_bf[r0:r0 + T, HD + h * D:HD + (h + 1) * D]            # (T, D)
            v = qkv_bf[r0:r0 + T, 2 * HD + h * D:2 * HD + (h + 1) * D]    # (T, D)

            # Contract last dims directly (no explicit K transpose); scale already in Q.
            s = lax.dot_general(q, k, (((1,), (1,)), ((), ())),
                                preferred_element_type=jnp.float32)       # (T, T) f32
            s = jnp.where(causal, s, neg_big)
            s = s - jnp.max(s, axis=-1, keepdims=True)
            e = jnp.exp(s)                                                # f32 softmax math
            inv_l = pl.reciprocal(jnp.sum(e, axis=-1, keepdims=True), approx=True)
            out_h = jnp.dot(e.astype(jnp.bfloat16), v,
                            preferred_element_type=jnp.float32) * inv_l   # (T, D) f32
            head_outs.append(out_h)
        blk_outs.append(jnp.concatenate(head_outs, axis=-1))              # (T, H*D)

    hcat = jnp.concatenate(blk_outs, axis=0)                              # (BB*T, H*D)

    # Fused output projection over the whole token block (single MXU push) + bias.
    y = jnp.dot(hcat.astype(jnp.bfloat16), wproj_ref[...],
                preferred_element_type=jnp.float32) + bproj_ref[...]
    o_ref[...] = y.astype(o_ref.dtype)


# ---------------------------------------------------------------------------
# Wrapper
# ---------------------------------------------------------------------------
def multi_head_attention(x, wq, wk, wv, w_proj, b_proj):
    """
    x:        (B, T, C)   float32
    wq/wk/wv: (H, C, D)   per-head weights (transposed nn.Linear weights)
    w_proj:   (H*D, C)    transposed nn.Linear weight
    b_proj:   (C,)        projection bias
    returns   (B, T, C)   float32
    """
    B, T, C = x.shape
    H, _, D = wq.shape
    HD = H * D

    # ---- one-time weight prep ----
    # Fold 1/sqrt(D) into the Q weights (free; removes a (T,T) multiply per head in-kernel).
    wq_scaled = wq * jnp.float32(D ** -0.5)

    def stack(w):  # (H, C, D) -> (C, H*D), head-major columns
        return jnp.transpose(w, (1, 0, 2)).reshape(C, HD)

    wqkv = jnp.concatenate([stack(wq_scaled), stack(wk), stack(wv)], axis=1)  # (C, 3*H*D)
    # Pad the QKV column count to a multiple of 128 so the qkv activation slab is lane-dense.
    pad = (-wqkv.shape[1]) % 128
    if pad:
        wqkv = jnp.pad(wqkv, ((0, 0), (0, pad)))
    n_cols = wqkv.shape[1]

    # bf16 operands, f32 accumulation inside the kernel.
    x_flat = x.reshape(B * T, C).astype(jnp.bfloat16)
    wqkv_bf = wqkv.astype(jnp.bfloat16)
    wproj_bf = w_proj.astype(jnp.bfloat16)
    b2d = b_proj.reshape(1, C).astype(jnp.float32)

    # Batch rows per grid step: aim for >=128 token rows per MXU push (capped at B, and kept
    # an exact divisor of B so the grid is exact). At B=2, T=8 this is the whole batch.
    bb = min(B, max(1, -(-128 // T)))
    while B % bb:
        bb -= 1
    rows = bb * T
    grid = (B // bb,)

    kernel = functools.partial(mha_fused_kernel, num_heads=H, head_size=D,
                               seq_len=T, batch_block=bb)

    out_flat = pl.pallas_call(
        kernel,
        out_shape=jax.ShapeDtypeStruct((B * T, C), x.dtype),
        grid_spec=pltpu.PrefetchScalarGridSpec(
            num_scalar_prefetch=0,
            grid=grid,
            in_specs=[
                pl.BlockSpec((rows, C), lambda i: (i, 0)),
                pl.BlockSpec((C, n_cols), lambda i: (0, 0)),
                pl.BlockSpec((HD, C), lambda i: (0, 0)),
                pl.BlockSpec((1, C), lambda i: (0, 0)),
            ],
            out_specs=pl.BlockSpec((rows, C), lambda i: (i, 0)),
        ),
        compiler_params=pltpu.CompilerParams(
            dimension_semantics=("parallel",)),
    )(x_flat, wqkv_bf, wproj_bf, b2d)

    return out_flat.reshape(B, T, C)


# pure-JAX f32 reference (matches the PyTorch module semantics)
def reference(x, wq, wk, wv, w_proj, b_proj):
    B, T, C = x.shape
    H, _, D = wq.shape
    q = jnp.einsum("btc,hcd->bhtd", x, wq)
    k = jnp.einsum("btc,hcd->bhtd", x, wk)
    v = jnp.einsum("btc,hcd->bhtd", x, wv)
    s = jnp.einsum("bhtd,bhsd->bhts", q, k) * (D ** -0.5)
    mask = jnp.tril(jnp.ones((T, T), dtype=bool))
    s = jnp.where(mask[None, None], s, -jnp.inf)
    w = jax.nn.softmax(s, axis=-1)
    o = jnp.einsum("bhts,bhsd->bhtd", w, v)
    o = jnp.transpose(o, (0, 2, 1, 3)).reshape(B, T, H * D)
    return o @ w_proj + b_proj


if __name__ == "__main__":
    # module hyper-params (small, consistent with the forward)
    block_size = 8     # T
    embed_size = 32    # C
    head_size = 8      # D
    num_heads = 4      # H
    B = 2

    key = jax.random.PRNGKey(0)
    kx, kq, kk, kv, kp, kb = jax.random.split(key, 6)

    x = jax.random.normal(kx, (B, block_size, embed_size), dtype=jnp.float32)

    scale_in = 1.0 / (embed_size ** 0.5)
    wq = jax.random.normal(kq, (num_heads, embed_size, head_size), jnp.float32) * scale_in
    wk = jax.random.normal(kk, (num_heads, embed_size, head_size), jnp.float32) * scale_in
    wv = jax.random.normal(kv, (num_heads, embed_size, head_size), jnp.float32) * scale_in

    hd = num_heads * head_size
    w_proj = jax.random.normal(kp, (hd, embed_size), jnp.float32) * (1.0 / hd ** 0.5)
    b_proj = jax.random.normal(kb, (embed_size,), jnp.float32) * 0.01

    out = multi_head_attention(x, wq, wk, wv, w_proj, b_proj)
    out = jax.block_until_ready(out)

    ref = reference(x, wq, wk, wv, w_proj, b_proj)
    assert out.shape == (B, block_size, embed_size)
    # Tolerance accounts for bf16 matmul operands (f32 accumulation) and the approx (EUP)
    # reciprocal in the softmax normalization, vs. the pure-f32 reference.
    assert jnp.allclose(out, ref, atol=1e-1, rtol=5e-2), "mismatch vs reference"

    print("KERNEL_OK")
</pallas_src>

<mosaic_0001>
module attributes {stable_mosaic.version = 11 : i64} {
  func.func @mha_fused_kernel(%arg0: i32, %arg1: memref<16x32xbf16, #tpu.memory_space<vmem>>, %arg2: memref<32x128xbf16, #tpu.memory_space<vmem>>, %arg3: memref<32x32xbf16, #tpu.memory_space<vmem>>, %arg4: memref<1x32xf32, #tpu.memory_space<vmem>>, %arg5: memref<16x32xf32, #tpu.memory_space<vmem>>) attributes {dimension_semantics = [#tpu.dimension_semantics<parallel>], iteration_bounds = array<i64: 1>, scalar_prefetch = 0 : i64, scratch_operands = 0 : i64, tpu.core_type = #tpu.core_type<tc>, window_params = [{transform_indices = @transform_0, window_bounds = array<i64: 16, 32>}, {pipeline_mode = #tpu.pipeline_mode<synchronous>, transform_indices = @transform_1, window_bounds = array<i64: 32, 128>}, {pipeline_mode = #tpu.pipeline_mode<synchronous>, transform_indices = @transform_2, window_bounds = array<i64: 32, 32>}, {pipeline_mode = #tpu.pipeline_mode<synchronous>, transform_indices = @transform_3, window_bounds = array<i64: 1, 32>}, {transform_indices = @transform_4, window_bounds = array<i64: 16, 32>}]} {
    %c0 = arith.constant 0 : index
    %c0_0 = arith.constant 0 : index
    %0 = vector.load %arg1[%c0, %c0_0] : memref<16x32xbf16, #tpu.memory_space<vmem>>, vector<16x32xbf16>
    %c0_1 = arith.constant 0 : index
    %c0_2 = arith.constant 0 : index
    %1 = vector.load %arg2[%c0_1, %c0_2] : memref<32x128xbf16, #tpu.memory_space<vmem>>, vector<32x128xbf16>
    %cst = arith.constant dense<0.000000e+00> : vector<16x128xf32>
    %2 = tpu.matmul %0, %1, %cst {dimension_numbers = #tpu.dot_dimension_numbers<[1], [0], [0], [1], [0, 0, 1, 1], [], []>} : vector<16x32xbf16>, vector<32x128xbf16>, vector<16x128xf32> -> vector<16x128xf32>
    %3 = arith.truncf %2 : vector<16x128xf32> to vector<16x128xbf16>
    %4 = tpu.iota {dimensions = array<i32: 0>} : vector<8x8xi32>
    %5 = tpu.iota {dimensions = array<i32: 1>} : vector<8x8xi32>
    %6 = arith.cmpi sle, %5, %4 : vector<8x8xi32>
    %7 = vector.extract_strided_slice %3 {offsets = [0, 0], sizes = [8, 8], strides = [1, 1]} : vector<16x128xbf16> to vector<8x8xbf16>
    %8 = vector.extract_strided_slice %3 {offsets = [0, 32], sizes = [8, 8], strides = [1, 1]} : vector<16x128xbf16> to vector<8x8xbf16>
    %9 = vector.extract_strided_slice %3 {offsets = [0, 64], sizes = [8, 8], strides = [1, 1]} : vector<16x128xbf16> to vector<8x8xbf16>
    %cst_3 = arith.constant dense<0.000000e+00> : vector<8x8xf32>
    %10 = tpu.matmul %7, %8, %cst_3 {dimension_numbers = #tpu.dot_dimension_numbers<[1], [1], [0], [0], [0, 0, 1, 0], [], []>} : vector<8x8xbf16>, vector<8x8xbf16>, vector<8x8xf32> -> vector<8x8xf32>
    %cst_4 = arith.constant -1.000000e+30 : f32
    %11 = vector.broadcast %cst_4 : f32 to vector<8x8xf32>
    %12 = arith.select %6, %10, %11 : vector<8x8xi1>, vector<8x8xf32>
    %cst_5 = arith.constant dense<0xFF800000> : vector<8xf32>
    %13 = vector.multi_reduction <maximumf>, %12, %cst_5 [1] : vector<8x8xf32> to vector<8xf32>
    %14 = vector.shape_cast %13 : vector<8xf32> to vector<8x1xf32>
    %15 = vector.broadcast %14 : vector<8x1xf32> to vector<8x8xf32>
    %16 = arith.subf %12, %15 : vector<8x8xf32>
    %17 = math.exp %16 : vector<8x8xf32>
    %cst_6 = arith.constant dense<0.000000e+00> : vector<8xf32>
    %18 = vector.multi_reduction <add>, %17, %cst_6 [1] : vector<8x8xf32> to vector<8xf32>
    %19 = vector.shape_cast %18 : vector<8xf32> to vector<8x1xf32>
    %20 = tpu.reciprocal %19 {approx = true} : vector<8x1xf32> -> vector<8x1xf32>
    %21 = arith.truncf %17 : vector<8x8xf32> to vector<8x8xbf16>
    %cst_7 = arith.constant dense<0.000000e+00> : vector<8x8xf32>
    %22 = tpu.matmul %21, %9, %cst_7 {dimension_numbers = #tpu.dot_dimension_numbers<[1], [0], [0], [1], [0, 0, 1, 1], [], []>} : vector<8x8xbf16>, vector<8x8xbf16>, vector<8x8xf32> -> vector<8x8xf32>
    %23 = vector.broadcast %20 : vector<8x1xf32> to vector<8x8xf32>
    %24 = arith.mulf %22, %23 : vector<8x8xf32>
    %25 = vector.extract_strided_slice %3 {offsets = [0, 8], sizes = [8, 8], strides = [1, 1]} : vector<16x128xbf16> to vector<8x8xbf16>
    %26 = vector.extract_strided_slice %3 {offsets = [0, 40], sizes = [8, 8], strides = [1, 1]} : vector<16x128xbf16> to vector<8x8xbf16>
    %27 = vector.extract_strided_slice %3 {offsets = [0, 72], sizes = [8, 8], strides = [1, 1]} : vector<16x128xbf16> to vector<8x8xbf16>
    %cst_8 = arith.constant dense<0.000000e+00> : vector<8x8xf32>
    %28 = tpu.matmul %25, %26, %cst_8 {dimension_numbers = #tpu.dot_dimension_numbers<[1], [1], [0], [0], [0, 0, 1, 0], [], []>} : vector<8x8xbf16>, vector<8x8xbf16>, vector<8x8xf32> -> vector<8x8xf32>
    %cst_9 = arith.constant -1.000000e+30 : f32
    %29 = vector.broadcast %cst_9 : f32 to vector<8x8xf32>
    %30 = arith.select %6, %28, %29 : vector<8x8xi1>, vector<8x8xf32>
    %cst_10 = arith.constant dense<0xFF800000> : vector<8xf32>
    %31 = vector.multi_reduction <maximumf>, %30, %cst_10 [1] : vector<8x8xf32> to vector<8xf32>
    %32 = vector.shape_cast %31 : vector<8xf32> to vector<8x1xf32>
    %33 = vector.broadcast %32 : vector<8x1xf32> to vector<8x8xf32>
    %34 = arith.subf %30, %33 : vector<8x8xf32>
    %35 = math.exp %34 : vector<8x8xf32>
    %cst_11 = arith.constant dense<0.000000e+00> : vector<8xf32>
    %36 = vector.multi_reduction <add>, %35, %cst_11 [1] : vector<8x8xf32> to vector<8xf32>
    %37 = vector.shape_cast %36 : vector<8xf32> to vector<8x1xf32>
    %38 = tpu.reciprocal %37 {approx = true} : vector<8x1xf32> -> vector<8x1xf32>
    %39 = arith.truncf %35 : vector<8x8xf32> to vector<8x8xbf16>
    %cst_12 = arith.constant dense<0.000000e+00> : vector<8x8xf32>
    %40 = tpu.matmul %39, %27, %cst_12 {dimension_numbers = #tpu.dot_dimension_numbers<[1], [0], [0], [1], [0, 0, 1, 1], [], []>} : vector<8x8xbf16>, vector<8x8xbf16>, vector<8x8xf32> -> vector<8x8xf32>
    %41 = vector.broadcast %38 : vector<8x1xf32> to vector<8x8xf32>
    %42 = arith.mulf %40, %41 : vector<8x8xf32>
    %43 = vector.extract_strided_slice %3 {offsets = [0, 16], sizes = [8, 8], strides = [1, 1]} : vector<16x128xbf16> to vector<8x8xbf16>
    %44 = vector.extract_strided_slice %3 {offsets = [0, 48], sizes = [8, 8], strides = [1, 1]} : vector<16x128xbf16> to vector<8x8xbf16>
    %45 = vector.extract_strided_slice %3 {offsets = [0, 80], sizes = [8, 8], strides = [1, 1]} : vector<16x128xbf16> to vector<8x8xbf16>
    %cst_13 = arith.constant dense<0.000000e+00> : vector<8x8xf32>
    %46 = tpu.matmul %43, %44, %cst_13 {dimension_numbers = #tpu.dot_dimension_numbers<[1], [1], [0], [0], [0, 0, 1, 0], [], []>} : vector<8x8xbf16>, vector<8x8xbf16>, vector<8x8xf32> -> vector<8x8xf32>
    %cst_14 = arith.constant -1.000000e+30 : f32
    %47 = vector.broadcast %cst_14 : f32 to vector<8x8xf32>
    %48 = arith.select %6, %46, %47 : vector<8x8xi1>, vector<8x8xf32>
    %cst_15 = arith.constant dense<0xFF800000> : vector<8xf32>
    %49 = vector.multi_reduction <maximumf>, %48, %cst_15 [1] : vector<8x8xf32> to vector<8xf32>
    %50 = vector.shape_cast %49 : vector<8xf32> to vector<8x1xf32>
    %51 = vector.broadcast %50 : vector<8x1xf32> to vector<8x8xf32>
    %52 = arith.subf %48, %51 : vector<8x8xf32>
    %53 = math.exp %52 : vector<8x8xf32>
    %cst_16 = arith.constant dense<0.000000e+00> : vector<8xf32>
    %54 = vector.multi_reduction <add>, %53, %cst_16 [1] : vector<8x8xf32> to vector<8xf32>
    %55 = vector.shape_cast %54 : vector<8xf32> to vector<8x1xf32>
    %56 = tpu.reciprocal %55 {approx = true} : vector<8x1xf32> -> vector<8x1xf32>
    %57 = arith.truncf %53 : vector<8x8xf32> to vector<8x8xbf16>
    %cst_17 = arith.constant dense<0.000000e+00> : vector<8x8xf32>
    %58 = tpu.matmul %57, %45, %cst_17 {dimension_numbers = #tpu.dot_dimension_numbers<[1], [0], [0], [1], [0, 0, 1, 1], [], []>} : vector<8x8xbf16>, vector<8x8xbf16>, vector<8x8xf32> -> vector<8x8xf32>
    %59 = vector.broadcast %56 : vector<8x1xf32> to vector<8x8xf32>
    %60 = arith.mulf %58, %59 : vector<8x8xf32>
    %61 = vector.extract_strided_slice %3 {offsets = [0, 24], sizes = [8, 8], strides = [1, 1]} : vector<16x128xbf16> to vector<8x8xbf16>
    %62 = vector.extract_strided_slice %3 {offsets = [0, 56], sizes = [8, 8], strides = [1, 1]} : vector<16x128xbf16> to vector<8x8xbf16>
    %63 = vector.extract_strided_slice %3 {offsets = [0, 88], sizes = [8, 8], strides = [1, 1]} : vector<16x128xbf16> to vector<8x8xbf16>
    %cst_18 = arith.constant dense<0.000000e+00> : vector<8x8xf32>
    %64 = tpu.matmul %61, %62, %cst_18 {dimension_numbers = #tpu.dot_dimension_numbers<[1], [1], [0], [0], [0, 0, 1, 0], [], []>} : vector<8x8xbf16>, vector<8x8xbf16>, vector<8x8xf32> -> vector<8x8xf32>
    %cst_19 = arith.constant -1.000000e+30 : f32
    %65 = vector.broadcast %cst_19 : f32 to vector<8x8xf32>
    %66 = arith.select %6, %64, %65 : vector<8x8xi1>, vector<8x8xf32>
    %cst_20 = arith.constant dense<0xFF800000> : vector<8xf32>
    %67 = vector.multi_reduction <maximumf>, %66, %cst_20 [1] : vector<8x8xf32> to vector<8xf32>
    %68 = vector.shape_cast %67 : vector<8xf32> to vector<8x1xf32>
    %69 = vector.broadcast %68 : vector<8x1xf32> to vector<8x8xf32>
    %70 = arith.subf %66, %69 : vector<8x8xf32>
    %71 = math.exp %70 : vector<8x8xf32>
    %cst_21 = arith.constant dense<0.000000e+00> : vector<8xf32>
    %72 = vector.multi_reduction <add>, %71, %cst_21 [1] : vector<8x8xf32> to vector<8xf32>
    %73 = vector.shape_cast %72 : vector<8xf32> to vector<8x1xf32>
    %74 = tpu.reciprocal %73 {approx = true} : vector<8x1xf32> -> vector<8x1xf32>
    %75 = arith.truncf %71 : vector<8x8xf32> to vector<8x8xbf16>
    %cst_22 = arith.constant dense<0.000000e+00> : vector<8x8xf32>
    %76 = tpu.matmul %75, %63, %cst_22 {dimension_numbers = #tpu.dot_dimension_numbers<[1], [0], [0], [1], [0, 0, 1, 1], [], []>} : vector<8x8xbf16>, vector<8x8xbf16>, vector<8x8xf32> -> vector<8x8xf32>
    %77 = vector.broadcast %74 : vector<8x1xf32> to vector<8x8xf32>
    %78 = arith.mulf %76, %77 : vector<8x8xf32>
    %79 = tpu.concatenate %24, %42, %60, %78 in 1 : vector<8x8xf32>, vector<8x8xf32>, vector<8x8xf32>, vector<8x8xf32> -> vector<8x32xf32>
    %80 = vector.extract_strided_slice %3 {offsets = [8, 0], sizes = [8, 8], strides = [1, 1]} : vector<16x128xbf16> to vector<8x8xbf16>
    %81 = vector.extract_strided_slice %3 {offsets = [8, 32], sizes = [8, 8], strides = [1, 1]} : vector<16x128xbf16> to vector<8x8xbf16>
    %82 = vector.extract_strided_slice %3 {offsets = [8, 64], sizes = [8, 8], strides = [1, 1]} : vector<16x128xbf16> to vector<8x8xbf16>
    %cst_23 = arith.constant dense<0.000000e+00> : vector<8x8xf32>
    %83 = tpu.matmul %80, %81, %cst_23 {dimension_numbers = #tpu.dot_dimension_numbers<[1], [1], [0], [0], [0, 0, 1, 0], [], []>} : vector<8x8xbf16>, vector<8x8xbf16>, vector<8x8xf32> -> vector<8x8xf32>
    %cst_24 = arith.constant -1.000000e+30 : f32
    %84 = vector.broadcast %cst_24 : f32 to vector<8x8xf32>
    %85 = arith.select %6, %83, %84 : vector<8x8xi1>, vector<8x8xf32>
    %cst_25 = arith.constant dense<0xFF800000> : vector<8xf32>
    %86 = vector.multi_reduction <maximumf>, %85, %cst_25 [1] : vector<8x8xf32> to vector<8xf32>
    %87 = vector.shape_cast %86 : vector<8xf32> to vector<8x1xf32>
    %88 = vector.broadcast %87 : vector<8x1xf32> to vector<8x8xf32>
    %89 = arith.subf %85, %88 : vector<8x8xf32>
    %90 = math.exp %89 : vector<8x8xf32>
    %cst_26 = arith.constant dense<0.000000e+00> : vector<8xf32>
    %91 = vector.multi_reduction <add>, %90, %cst_26 [1] : vector<8x8xf32> to vector<8xf32>
    %92 = vector.shape_cast %91 : vector<8xf32> to vector<8x1xf32>
    %93 = tpu.reciprocal %92 {approx = true} : vector<8x1xf32> -> vector<8x1xf32>
    %94 = arith.truncf %90 : vector<8x8xf32> to vector<8x8xbf16>
    %cst_27 = arith.constant dense<0.000000e+00> : vector<8x8xf32>
    %95 = tpu.matmul %94, %82, %cst_27 {dimension_numbers = #tpu.dot_dimension_numbers<[1], [0], [0], [1], [0, 0, 1, 1], [], []>} : vector<8x8xbf16>, vector<8x8xbf16>, vector<8x8xf32> -> vector<8x8xf32>
    %96 = vector.broadcast %93 : vector<8x1xf32> to vector<8x8xf32>
    %97 = arith.mulf %95, %96 : vector<8x8xf32>
    %98 = vector.extract_strided_slice %3 {offsets = [8, 8], sizes = [8, 8], strides = [1, 1]} : vector<16x128xbf16> to vector<8x8xbf16>
    %99 = vector.extract_strided_slice %3 {offsets = [8, 40], sizes = [8, 8], strides = [1, 1]} : vector<16x128xbf16> to vector<8x8xbf16>
    %100 = vector.extract_strided_slice %3 {offsets = [8, 72], sizes = [8, 8], strides = [1, 1]} : vector<16x128xbf16> to vector<8x8xbf16>
    %cst_28 = arith.constant dense<0.000000e+00> : vector<8x8xf32>
    %101 = tpu.matmul %98, %99, %cst_28 {dimension_numbers = #tpu.dot_dimension_numbers<[1], [1], [0], [0], [0, 0, 1, 0], [], []>} : vector<8x8xbf16>, vector<8x8xbf16>, vector<8x8xf32> -> vector<8x8xf32>
    %cst_29 = arith.constant -1.000000e+30 : f32
    %102 = vector.broadcast %cst_29 : f32 to vector<8x8xf32>
    %103 = arith.select %6, %101, %102 : vector<8x8xi1>, vector<8x8xf32>
    %cst_30 = arith.constant dense<0xFF800000> : vector<8xf32>
    %104 = vector.multi_reduction <maximumf>, %103, %cst_30 [1] : vector<8x8xf32> to vector<8xf32>
    %105 = vector.shape_cast %104 : vector<8xf32> to vector<8x1xf32>
    %106 = vector.broadcast %105 : vector<8x1xf32> to vector<8x8xf32>
    %107 = arith.subf %103, %106 : vector<8x8xf32>
    %108 = math.exp %107 : vector<8x8xf32>
    %cst_31 = arith.constant dense<0.000000e+00> : vector<8xf32>
    %109 = vector.multi_reduction <add>, %108, %cst_31 [1] : vector<8x8xf32> to vector<8xf32>
    %110 = vector.shape_cast %109 : vector<8xf32> to vector<8x1xf32>
    %111 = tpu.reciprocal %110 {approx = true} : vector<8x1xf32> -> vector<8x1xf32>
    %112 = arith.truncf %108 : vector<8x8xf32> to vector<8x8xbf16>
    %cst_32 = arith.constant dense<0.000000e+00> : vector<8x8xf32>
    %113 = tpu.matmul %112, %100, %cst_32 {dimension_numbers = #tpu.dot_dimension_numbers<[1], [0], [0], [1], [0, 0, 1, 1], [], []>} : vector<8x8xbf16>, vector<8x8xbf16>, vector<8x8xf32> -> vector<8x8xf32>
    %114 = vector.broadcast %111 : vector<8x1xf32> to vector<8x8xf32>
    %115 = arith.mulf %113, %114 : vector<8x8xf32>
    %116 = vector.extract_strided_slice %3 {offsets = [8, 16], sizes = [8, 8], strides = [1, 1]} : vector<16x128xbf16> to vector<8x8xbf16>
    %117 = vector.extract_strided_slice %3 {offsets = [8, 48], sizes = [8, 8], strides = [1, 1]} : vector<16x128xbf16> to vector<8x8xbf16>
    %118 = vector.extract_strided_slice %3 {offsets = [8, 80], sizes = [8, 8], strides = [1, 1]} : vector<16x128xbf16> to vector<8x8xbf16>
    %cst_33 = arith.constant dense<0.000000e+00> : vector<8x8xf32>
    %119 = tpu.matmul %116, %117, %cst_33 {dimension_numbers = #tpu.dot_dimension_numbers<[1], [1], [0], [0], [0, 0, 1, 0], [], []>} : vector<8x8xbf16>, vector<8x8xbf16>, vector<8x8xf32> -> vector<8x8xf32>
    %cst_34 = arith.constant -1.000000e+30 : f32
    %120 = vector.broadcast %cst_34 : f32 to vector<8x8xf32>
    %121 = arith.select %6, %119, %120 : vector<8x8xi1>, vector<8x8xf32>
    %cst_35 = arith.constant dense<0xFF800000> : vector<8xf32>
    %122 = vector.multi_reduction <maximumf>, %121, %cst_35 [1] : vector<8x8xf32> to vector<8xf32>
    %123 = vector.shape_cast %122 : vector<8xf32> to vector<8x1xf32>
    %124 = vector.broadcast %123 : vector<8x1xf32> to vector<8x8xf32>
    %125 = arith.subf %121, %124 : vector<8x8xf32>
    %126 = math.exp %125 : vector<8x8xf32>
    %cst_36 = arith.constant dense<0.000000e+00> : vector<8xf32>
    %127 = vector.multi_reduction <add>, %126, %cst_36 [1] : vector<8x8xf32> to vector<8xf32>
    %128 = vector.shape_cast %127 : vector<8xf32> to vector<8x1xf32>
    %129 = tpu.reciprocal %128 {approx = true} : vector<8x1xf32> -> vector<8x1xf32>
    %130 = arith.truncf %126 : vector<8x8xf32> to vector<8x8xbf16>
    %cst_37 = arith.constant dense<0.000000e+00> : vector<8x8xf32>
    %131 = tpu.matmul %130, %118, %cst_37 {dimension_numbers = #tpu.dot_dimension_numbers<[1], [0], [0], [1], [0, 0, 1, 1], [], []>} : vector<8x8xbf16>, vector<8x8xbf16>, vector<8x8xf32> -> vector<8x8xf32>
    %132 = vector.broadcast %129 : vector<8x1xf32> to vector<8x8xf32>
    %133 = arith.mulf %131, %132 : vector<8x8xf32>
    %134 = vector.extract_strided_slice %3 {offsets = [8, 24], sizes = [8, 8], strides = [1, 1]} : vector<16x128xbf16> to vector<8x8xbf16>
    %135 = vector.extract_strided_slice %3 {offsets = [8, 56], sizes = [8, 8], strides = [1, 1]} : vector<16x128xbf16> to vector<8x8xbf16>
    %136 = vector.extract_strided_slice %3 {offsets = [8, 88], sizes = [8, 8], strides = [1, 1]} : vector<16x128xbf16> to vector<8x8xbf16>
    %cst_38 = arith.constant dense<0.000000e+00> : vector<8x8xf32>
    %137 = tpu.matmul %134, %135, %cst_38 {dimension_numbers = #tpu.dot_dimension_numbers<[1], [1], [0], [0], [0, 0, 1, 0], [], []>} : vector<8x8xbf16>, vector<8x8xbf16>, vector<8x8xf32> -> vector<8x8xf32>
    %cst_39 = arith.constant -1.000000e+30 : f32
    %138 = vector.broadcast %cst_39 : f32 to vector<8x8xf32>
    %139 = arith.select %6, %137, %138 : vector<8x8xi1>, vector<8x8xf32>
    %cst_40 = arith.constant dense<0xFF800000> : vector<8xf32>
    %140 = vector.multi_reduction <maximumf>, %139, %cst_40 [1] : vector<8x8xf32> to vector<8xf32>
    %141 = vector.shape_cast %140 : vector<8xf32> to vector<8x1xf32>
    %142 = vector.broadcast %141 : vector<8x1xf32> to vector<8x8xf32>
    %143 = arith.subf %139, %142 : vector<8x8xf32>
    %144 = math.exp %143 : vector<8x8xf32>
    %cst_41 = arith.constant dense<0.000000e+00> : vector<8xf32>
    %145 = vector.multi_reduction <add>, %144, %cst_41 [1] : vector<8x8xf32> to vector<8xf32>
    %146 = vector.shape_cast %145 : vector<8xf32> to vector<8x1xf32>
    %147 = tpu.reciprocal %146 {approx = true} : vector<8x1xf32> -> vector<8x1xf32>
    %148 = arith.truncf %144 : vector<8x8xf32> to vector<8x8xbf16>
    %cst_42 = arith.constant dense<0.000000e+00> : vector<8x8xf32>
    %149 = tpu.matmul %148, %136, %cst_42 {dimension_numbers = #tpu.dot_dimension_numbers<[1], [0], [0], [1], [0, 0, 1, 1], [], []>} : vector<8x8xbf16>, vector<8x8xbf16>, vector<8x8xf32> -> vector<8x8xf32>
    %150 = vector.broadcast %147 : vector<8x1xf32> to vector<8x8xf32>
    %151 = arith.mulf %149, %150 : vector<8x8xf32>
    %152 = tpu.concatenate %97, %115, %133, %151 in 1 : vector<8x8xf32>, vector<8x8xf32>, vector<8x8xf32>, vector<8x8xf32> -> vector<8x32xf32>
    %153 = tpu.concatenate %79, %152 in 0 : vector<8x32xf32>, vector<8x32xf32> -> vector<16x32xf32>
    %154 = arith.truncf %153 : vector<16x32xf32> to vector<16x32xbf16>
    %c0_43 = arith.constant 0 : index
    %c0_44 = arith.constant 0 : index
    %155 = vector.load %arg3[%c0_43, %c0_44] : memref<32x32xbf16, #tpu.memory_space<vmem>>, vector<32x32xbf16>
    %cst_45 = arith.constant dense<0.000000e+00> : vector<16x32xf32>
    %156 = tpu.matmul %154, %155, %cst_45 {dimension_numbers = #tpu.dot_dimension_numbers<[1], [0], [0], [1], [0, 0, 1, 1], [], []>} : vector<16x32xbf16>, vector<32x32xbf16>, vector<16x32xf32> -> vector<16x32xf32>
    %c0_46 = arith.constant 0 : index
    %c0_47 = arith.constant 0 : index
    %157 = vector.load %arg4[%c0_46, %c0_47] : memref<1x32xf32, #tpu.memory_space<vmem>>, vector<1x32xf32>
    %158 = vector.broadcast %157 : vector<1x32xf32> to vector<16x32xf32>
    %159 = arith.addf %156, %158 : vector<16x32xf32>
    %c0_48 = arith.constant 0 : index
    %c0_49 = arith.constant 0 : index
    %160 = vector.load %arg5[%c0_48, %c0_49] : memref<16x32xf32, #tpu.memory_space<vmem>>, vector<16x32xf32>
    tpu.vector_store %arg5[%c0_48, %c0_49], %159 {strides = array<i32>} : memref<16x32xf32, #tpu.memory_space<vmem>>, vector<16x32xf32>,
    return
  }
  func.func @transform_0(%arg0: i32) -> (i32, i32) {
    %c0_i32 = arith.constant 0 : i32
    %c0_i32_0 = arith.constant 0 : i32
    return %arg0, %c0_i32 : i32, i32
  }
  func.func @transform_1(%arg0: i32) -> (i32, i32) {
    %c0_i32 = arith.constant 0 : i32
    %c0_i32_0 = arith.constant 0 : i32
    %c0_i32_1 = arith.constant 0 : i32
    return %c0_i32, %c0_i32_0 : i32, i32
  }
  func.func @transform_2(%arg0: i32) -> (i32, i32) {
    %c0_i32 = arith.constant 0 : i32
    %c0_i32_0 = arith.constant 0 : i32
    %c0_i32_1 = arith.constant 0 : i32
    return %c0_i32, %c0_i32_0 : i32, i32
  }
  func.func @transform_3(%arg0: i32) -> (i32, i32) {
    %c0_i32 = arith.constant 0 : i32
    %c0_i32_0 = arith.constant 0 : i32
    %c0_i32_1 = arith.constant 0 : i32
    return %c0_i32, %c0_i32_0 : i32, i32
  }
  func.func @transform_4(%arg0: i32) -> (i32, i32) {
    %c0_i32 = arith.constant 0 : i32
    %c0_i32_0 = arith.constant 0 : i32
    return %arg0, %c0_i32 : i32, i32
  }
}

</mosaic_0001>

<bundles_post_ra>
// kernel: tpu_custom_call.1
= control target key start
LH: loop header
LB: loop body
LE: loop exit
PB: predicated region body
PF: predicated region fallthrough
CT: control target
= control target key end

     0   :  { %9 = vsyncpa [#allocation3], 0  ;;  %s1724_s0 = inlined_call_operand.hbm [shape: bf16[16,32], index: 0, kind: input, shape index: {}]   ;;  %s1725_s1 = inlined_call_operand.hbm [shape: bf16[32,128], index: 1, kind: input, shape index: {}]   ;;  %s1726_s2 = inlined_call_operand.hbm [shape: bf16[32,32], index: 2, kind: input, shape index: {}]   ;;  %s1727_s3 = inlined_call_operand.vmem [shape: f32[1,32], index: 3, kind: input, shape index: {}]   ;;  %s1728_s4 = inlined_call_operand.hbm [shape: f32[16,32], index: 4, kind: output, shape index: {}]  }
   0x1   :  { %10 = vsyncpa [#allocation6], 0 }
   0x2   :  { %11 = vsyncpa [#allocation4], 0  ;;  %s1476_s15 = smov [#allocation5]   ;;  %s1477_s17 = smov [#allocation2]  }
   0x3   :  { %s29_s16 = sshll.u32 %s1476_s15, 4  ;;  %s17_s18 = sshll.u32 %s1477_s17, 4  ;;  %s30_s16 = int_to_ptr.vmem [resolvable:$true] %s29_s16  ;;  %s18_s18 = int_to_ptr.vmem [resolvable:$true] %s17_s18 }
   0x4   :  { %s1398_s19 = scalar_lea.vmem %s30_s16, 256  ;;  %p1403_p1 = scmp.lt.s32.totalorder %s30_s16, %s30_s16 }
   0x5   :  { %p1399_p0 = scmp.ne.s32.totalorder %s30_s16, %s1398_s19  ;;  %p1404_p2 = scmp.lt.s32.totalorder %s1398_s19, %s1398_s19 }
   0x7   :  { %p1405_p3 = por %p1404_p2, %p1403_p1 }
   0x9   :  { %p1406_p4 = pnand %p1405_p3, %p1399_p0 }
   0xb   :  { %1409 = shalt.err (!%p1406_p4)
}
   0xc   :  { %s1478_s20 = smov 64   ;;  %s1479_s21 = smov 4  }
   0xd   :  { %35 = dma.hbm_to_vmem [thread:$0]  %s1725_s1, 256, %s30_s16, [#allocation6], %s1478_s20, %s1478_s20, %s1479_s21  }
   0xe   :  { %s1418_s24 = scalar_lea.vmem %s18_s18, 128  ;;  %p1423_p6 = scmp.lt.s32.totalorder %s18_s18, %s18_s18 }
   0xf   :  { %p1419_p5 = scmp.ne.s32.totalorder %s18_s18, %s1418_s24  ;;  %p1424_p7 = scmp.lt.s32.totalorder %s1418_s24, %s1418_s24 }
  0x11   :  { %p1425_p8 = por %p1424_p7, %p1423_p6 }
  0x13   :  { %p1426_p9 = pnand %p1425_p8, %p1419_p5 }
  0x15   :  { %1429 = shalt.err (!%p1426_p9)
}
  0x16   :  { %23 = dma.hbm_to_vmem [thread:$0]  %s1724_s0, 128, %s18_s18, [#allocation3], %s1478_s20, %s1478_s20, %s1479_s21  }
  0x17   :  { %s1480_s27 = smov [#allocation7]  }
  0x18   :  { %s41_s28 = sshll.u32 %s1480_s27, 4  ;;  %s42_s28 = int_to_ptr.vmem [resolvable:$true] %s41_s28 }
  0x19   :  { %s1438_s29 = scalar_lea.vmem %s42_s28, 256  ;;  %p1443_p11 = scmp.lt.s32.totalorder %s42_s28, %s42_s28 }
  0x1a   :  { %p1439_p10 = scmp.ne.s32.totalorder %s42_s28, %s1438_s29  ;;  %p1444_p12 = scmp.lt.s32.totalorder %s1438_s29, %s1438_s29 }
  0x1c   :  { %p1445_p13 = por %p1444_p12, %p1443_p11 }
  0x1e   :  { %p1446_p0 = pnand %p1445_p13, %p1439_p10 }
  0x20   :  { %1449 = shalt.err (!%p1446_p0)
}
  0x21   :  { %47 = dma.hbm_to_vmem [thread:$0]  %s1726_s2, 256, %s42_s28, [#allocation6], %s1478_s20, %s1478_s20, %s1479_s21  }
  0x22   :  { %1470 = dma.done.wait [#allocation3], 128  }
  0x23   :  { %1471 = vsyncadd [#allocation3], 4294967168 }
  0x24   :  { %1472 = dma.done.wait [#allocation6], 512  }
  0x25   :  { %1473 = vsyncadd [#allocation6], 4294966784  ;;  %v1481_v0 = vmov 0.0   ;;  %vm1482_vm0 = vmmov 0   ;;  %v1353_v1 = vld [vmem:[#allocation5 + $0x8] sm:$0xff]   ;;  %v1354_v2 = vld [vmem:[#allocation5] sm:$0xff]   ;;  %v129_v34 = vlaneseq }
  0x26   :  { %1204 = vmatprep.subr.bf16.mxu0 %v1481_v0  ;;  %1208 = vmatprep.mubr.msk.bf16.mxu0 %vm1482_vm0, %v1481_v0  ;;  %v1355_v3 = vld [vmem:[#allocation2] sm:$0xff]   ;;  %vm83_vm1 = vcmask 261120   ;;  %s1483_s0 = smov 120   ;;  %s1484_s2 = smov 96   ;;  %vm137_vm2 = vcmask 64512   ;;  %vm201_vm3 = vcmask 1043456  }
  0x27   :  { %1212 = vmatprep.subr.bf16.mxu1 %v1481_v0  ;;  %1214 = vmatprep.mubr.msk.bf16.mxu1 %vm1482_vm0, %v1481_v0  ;;  %s1485_s5 = smov 80   ;;  %s1486_s6 = smov 88   ;;  %v130_v35 = vshrl.u32 %v129_v34, 7  ;;  %v132_v36 = vand.u32 127, %v129_v34  ;;  %vm592_vm5 = vcmask 130048   ;;  %vm594_vm6 = vcmask 195584  }
  0x28   :  { %1205 = vmatpush3.bf16.msra.mxu0 %v1353_v1  ;;  %s1487_s7 = smov 72   ;;  %s1488_s8 = smov 112  }
  0x29   :  { %1206 = vmatprep.subr.bf16.mxu0 %v1481_v0  ;;  %s1489_s9 = smov 104   ;;  %s1490_s10 = smov 56   ;;  %vm1616_vm4 = vcmp.le.s32.totalorder %v132_v36, %v130_v35 }
  0x2a   :  { %s1491_s11 = smov 48   ;;  %s1492_s12 = smov 40  }
  0x2b   :  { %s1493_s13 = smov 8   ;;  %s1494_s14 = smov 16  }
  0x2c   :  { %1207 = vmatpush3.bf16.msra.mxu0 %v1354_v2  ;;  %s1495_s15 = smov 24   ;;  %s1496_s18 = smov [#allocation8]  }
  0x2d   :  { %1218 = vmatprep.subr.bf16.mxu0 %v1481_v0  ;;  %s1129_s19 = sshll.u32 %s1496_s18, 4  ;;  %s1130_s19 = int_to_ptr.vmem [resolvable:$true] %s1129_s19 }
  0x2e   :  { %p1455_p2 = scmp.lt.s32.totalorder %s1130_s19, %s1130_s19 }
  0x2f   :  { %1209 = vmatmul.mubr.msk.bf16.vlgmr.msra.gmra.mxu0 %vm83_vm1, %v1355_v3 }
  0x30   :  { %1220 = vmatprep.mubr.msk.bf16.mxu0 %vm1482_vm0, %v1481_v0 }
  0xef   :  { %v121_v4 = vpop.f32.mrf.mxu0 }
  0xf1   :  { %v1210_v5 = vpop.f32.mrf.mxu0 }
  0xf3   :  { %v124_v6 = vpop.f32.mrf.mxu0 }
  0xf4   :  { %v1549_v7 = vpack.c.bf16 %v124_v6, %v121_v4 }
  0xf5   :  { %v1211_v8 = vpop.f32.mrf.mxu0 }
  0xf6   :  { %246 = vrot.lane.b32.xlu1 %v1549_v7, %s1483_s0  ;;  %135 = vrot.lane.b32.xlu0 %v1549_v7, %s1484_s2  ;;  %v1558_v9 = vrot.slane %v1549_v7, 4 }
  0xfa   :  { %359 = vrot.lane.b32.xlu1 %v1549_v7, %s1485_s5  ;;  %248 = vrot.lane.b32.xlu0 %v1549_v7, %s1486_s6 }
  0xfe   :  { %470 = vrot.lane.b32.xlu1 %v1549_v7, %s1487_s7  ;;  %357 = vrot.lane.b32.xlu0 %v1549_v7, %s1488_s8 }
 0x102   :  { %468 = vrot.lane.b32.xlu0 %v1549_v7, %s1489_s9  ;;  %597 = vrot.lane.b32.xlu1 %v1558_v9, %s1484_s2 }
 0x106   :  { %708 = vrot.lane.b32.xlu0 %v1558_v9, %s1486_s6  ;;  %706 = vrot.lane.b32.xlu1 %v1558_v9, %s1483_s0 }
 0x10a   :  { %819 = vrot.lane.b32.xlu0 %v1558_v9, %s1485_s5  ;;  %817 = vrot.lane.b32.xlu1 %v1558_v9, %s1488_s8 }
 0x10e   :  { %930 = vrot.lane.b32.xlu0 %v1558_v9, %s1487_s7  ;;  %928 = vrot.lane.b32.xlu1 %v1558_v9, %s1489_s9 }
 0x112   :  { %308 = vrot.lane.b32.xlu0 %v1549_v7, %s1490_s10  ;;  %196 = vrot.lane.b32.xlu1 %v1549_v7, %s1478_s20 }
 0x168   :  { %v247_v10 = vpop.permute.xlu1 %246  ;;  %v136_v11 = vpop.permute.xlu0 %135 }
 0x169   :  { %v142_v12 = vsel %vm137_vm2, %v136_v11, 0 }
 0x16a   :  { %1213 = vmatpush3.bf16.xpose.msra.mxu1 %v142_v12 }
 0x16b   :  { %1224 = vmatprep.subr.bf16.mxu1 %v1481_v0 }
 0x16c   :  { %v360_v13 = vpop.permute.xlu1 %359  ;;  %v249_v14 = vpop.permute.xlu0 %248 }
 0x16d   :  { %v254_v16 = vsel %vm137_vm2, %v249_v14, 0  ;;  %v365_v19 = vsel %vm137_vm2, %v360_v13, 0 }
 0x170   :  { %v471_v15 = vpop.permute.xlu1 %470  ;;  %v358_v21 = vpop.permute.xlu0 %357 }
 0x171   :  { %1215 = vmatmul.mubr.msk.bf16.vlgmr.msra.gmra.mxu1 %vm137_vm2, %v1549_v7  ;;  %v476_v23 = vsel %vm137_vm2, %v471_v15, 0 }
 0x172   :  { %1225 = vmatpush3.bf16.xpose.msra.mxu1 %v254_v16  ;;  %1226 = vmatprep.mubr.msk.bf16.mxu1 %vm1482_vm0, %v1481_v0 }
 0x173   :  { %1236 = vmatprep.subr.bf16.mxu1 %v1481_v0 }
 0x174   :  { %v598_v17 = vpop.permute.xlu1 %597  ;;  %v469_v26 = vpop.permute.xlu0 %468 }
 0x175   :  { %v603_v27 = vsel %vm137_vm2, %v598_v17, 0 }
 0x178   :  { %v707_v18 = vpop.permute.xlu1 %706  ;;  %v709_v28 = vpop.permute.xlu0 %708 }
 0x179   :  { %1227 = vmatmul.mubr.msk.bf16.vlgmr.msra.gmra.mxu1 %vm137_vm2, %v247_v10  ;;  %v714_v29 = vsel %vm137_vm2, %v709_v28, 0 }
 0x17a   :  { %1237 = vmatpush3.bf16.xpose.msra.mxu1 %v365_v19  ;;  %1238 = vmatprep.mubr.msk.bf16.mxu1 %vm1482_vm0, %v1481_v0 }
 0x17b   :  { %1248 = vmatprep.subr.bf16.mxu1 %v1481_v0 }
 0x17c   :  { %v818_v20 = vpop.permute.xlu1 %817  ;;  %v820_v30 = vpop.permute.xlu0 %819 }
 0x17d   :  { %v825_v31 = vsel %vm137_vm2, %v820_v30, 0 }
 0x180   :  { %v929_v22 = vpop.permute.xlu1 %928  ;;  %v931_v32 = vpop.permute.xlu0 %930 }
 0x181   :  { %1239 = vmatmul.mubr.msk.bf16.vlgmr.msra.gmra.mxu1 %vm137_vm2, %v358_v21  ;;  %v936_v33 = vsel %vm137_vm2, %v931_v32, 0 }
 0x182   :  { %1249 = vmatpush3.bf16.xpose.msra.mxu1 %v476_v23  ;;  %1250 = vmatprep.mubr.msk.bf16.mxu1 %vm1482_vm0, %v1481_v0 }
 0x183   :  { %1260 = vmatprep.subr.bf16.mxu1 %v1481_v0 }
 0x184   :  { %v197_v24 = vpop.permute.xlu1 %196 }
 0x185   :  { %v203_v25 = vsel %vm201_vm3, %v197_v24, 0  ;;  %v309_v24 = vpop.permute.xlu0 %308 }
 0x186   :  { %1219 = vmatpush3.bf16.msra.mxu0 %v203_v25 }
 0x187   :  { %1230 = vmatprep.subr.bf16.mxu0 %v1481_v0 }
 0x189   :  { %1251 = vmatmul.mubr.msk.bf16.vlgmr.msra.gmra.mxu1 %vm137_vm2, %v469_v26 }
 0x18a   :  { %1261 = vmatpush3.bf16.xpose.msra.mxu1 %v603_v27  ;;  %1262 = vmatprep.mubr.msk.bf16.mxu1 %vm1482_vm0, %v1481_v0 }
 0x18b   :  { %1272 = vmatprep.subr.bf16.mxu1 %v1481_v0 }
 0x191   :  { %1263 = vmatmul.mubr.msk.bf16.vlgmr.msra.gmra.mxu1 %vm137_vm2, %v1558_v9 }
 0x192   :  { %1273 = vmatpush3.bf16.xpose.msra.mxu1 %v714_v29  ;;  %1274 = vmatprep.mubr.msk.bf16.mxu1 %vm1482_vm0, %v1481_v0 }
 0x193   :  { %1284 = vmatprep.subr.bf16.mxu1 %v1481_v0 }
 0x199   :  { %1275 = vmatmul.mubr.msk.bf16.vlgmr.msra.gmra.mxu1 %vm137_vm2, %v707_v18 }
 0x19a   :  { %1285 = vmatpush3.bf16.xpose.msra.mxu1 %v825_v31  ;;  %1286 = vmatprep.mubr.msk.bf16.mxu1 %vm1482_vm0, %v1481_v0 }
 0x19b   :  { %1296 = vmatprep.subr.bf16.mxu1 %v1481_v0 }
 0x1a1   :  { %1287 = vmatmul.mubr.msk.bf16.vlgmr.msra.gmra.mxu1 %vm137_vm2, %v818_v20 }
 0x1a2   :  { %1297 = vmatpush3.bf16.xpose.msra.mxu1 %v936_v33  ;;  %1298 = vmatprep.mubr.msk.bf16.mxu1 %vm1482_vm0, %v1481_v0  ;;  %v314_v33 = vsel %vm201_vm3, %v309_v24, 0 }
 0x1a3   :  { %1308 = vmatprep.subr.bf16.mxu1 %v1481_v0 }
 0x1a9   :  { %1299 = vmatmul.mubr.msk.bf16.vlgmr.msra.gmra.mxu1 %vm137_vm2, %v929_v22 }
 0x1aa   :  { %1312 = vmatprep.mubr.msk.bf16.mxu1 %vm1482_vm0, %v1481_v0 }
 0x231   :  { %v178_v38 = vpop.f32.mrf.mxu1 }
 0x232   :  { %v1622_v39 = vsel %vm1616_vm4, %v178_v38, -1e+30 }
 0x233   :  { %v1216_v40 = vpop.f32.mrf.mxu1  ;;  %v185_v41 = vsel %vm137_vm2, %v1622_v39, -inf }
 0x234   :  { %186 = vmax.xlane.f32.xlu0 %v185_v41 }
 0x235   :  { %v181_v42 = vpop.f32.mrf.mxu1 }
 0x237   :  { %v1217_v43 = vpop.f32.mrf.mxu1 }
 0x239   :  { %v290_v44 = vpop.f32.mrf.mxu1 }
 0x23a   :  { %v1628_v45 = vsel %vm1616_vm4, %v290_v44, -1e+30 }
 0x23b   :  { %v1228_v46 = vpop.f32.mrf.mxu1  ;;  %v297_v47 = vsel %vm137_vm2, %v1628_v45, -inf }
 0x23c   :  { %298 = vmax.xlane.f32.xlu1 %v297_v47 }
 0x23d   :  { %v293_v48 = vpop.f32.mrf.mxu1 }
 0x23f   :  { %v1229_v49 = vpop.f32.mrf.mxu1 }
 0x241   :  { %v401_v50 = vpop.f32.mrf.mxu1 }
 0x242   :  { %v407_v5 = vsel %vm1616_vm4, %v401_v50, -1e+30 }
 0x243   :  { %v1240_v51 = vpop.f32.mrf.mxu1  ;;  %v408_v10 = vsel %vm137_vm2, %v407_v5, -inf }
 0x245   :  { %v404_v52 = vpop.f32.mrf.mxu1 }
 0x247   :  { %v1241_v53 = vpop.f32.mrf.mxu1 }
 0x249   :  { %v512_v54 = vpop.f32.mrf.mxu1 }
 0x24a   :  { %419 = vrot.lane.b32.xlu0 %v1549_v7, %s1491_s11 }
 0x24b   :  { %v1252_v55 = vpop.f32.mrf.mxu1 }
 0x24d   :  { %v515_v56 = vpop.f32.mrf.mxu1  ;;  %530 = vrot.lane.b32.xlu1 %v1549_v7, %s1492_s12  ;;  %v518_v7 = vsel %vm1616_vm4, %v512_v54, -1e+30 }
 0x24e   :  { %v519_v13 = vsel %vm137_vm2, %v518_v7, -inf }
 0x24f   :  { %v1253_v57 = vpop.f32.mrf.mxu1 }
 0x251   :  { %v639_v58 = vpop.f32.mrf.mxu1 }
 0x252   :  { %v645_v14 = vsel %vm1616_vm4, %v639_v58, -1e+30 }
 0x253   :  { %v1264_v59 = vpop.f32.mrf.mxu1  ;;  %v646_v18 = vsel %vm137_vm2, %v645_v14, -inf }
 0x255   :  { %v642_v60 = vpop.f32.mrf.mxu1 }
 0x257   :  { %v1265_v61 = vpop.f32.mrf.mxu1 }
 0x259   :  { %v750_v62 = vpop.f32.mrf.mxu1 }
 0x25a   :  { %v756_v15 = vsel %vm1616_vm4, %v750_v62, -1e+30 }
 0x25b   :  { %v1276_v63 = vpop.f32.mrf.mxu1  ;;  %v757_v19 = vsel %vm137_vm2, %v756_v15, -inf }
 0x25d   :  { %v753_v1 = vpop.f32.mrf.mxu1 }
 0x25f   :  { %v1277_v2 = vpop.f32.mrf.mxu1 }
 0x261   :  { %v861_v3 = vpop.f32.mrf.mxu1 }
 0x262   :  { %v867_v20 = vsel %vm1616_vm4, %v861_v3, -1e+30 }
 0x263   :  { %v1288_v4 = vpop.f32.mrf.mxu1  ;;  %v868_v21 = vsel %vm137_vm2, %v867_v20, -inf }
 0x265   :  { %v864_v6 = vpop.f32.mrf.mxu1 }
 0x267   :  { %v1289_v8 = vpop.f32.mrf.mxu1 }
 0x269   :  { %409 = vmax.xlane.f32.xlu0 %v408_v10  ;;  %v972_v11 = vpop.f32.mrf.mxu1 }
 0x26a   :  { %v978_v22 = vsel %vm1616_vm4, %v972_v11, -1e+30 }
 0x26b   :  { %v1300_v12 = vpop.f32.mrf.mxu1  ;;  %v979_v23 = vsel %vm137_vm2, %v978_v22, -inf }
 0x26d   :  { %520 = vmax.xlane.f32.xlu0 %v519_v13  ;;  %v975_v16 = vpop.f32.mrf.mxu1 }
 0x26f   :  { %v1301_v17 = vpop.f32.mrf.mxu1 }
 0x271   :  { %647 = vmax.xlane.f32.xlu0 %v646_v18  ;;  %758 = vmax.xlane.f32.xlu1 %v757_v19 }
 0x275   :  { %869 = vmax.xlane.f32.xlu0 %v868_v21 }
 0x279   :  { %980 = vmax.xlane.f32.xlu0 %v979_v23 }
 0x282   :  { %768 = vrot.lane.b32.xlu1 %v1558_v9, %s1490_s10 }
 0x286   :  { %879 = vrot.lane.b32.xlu1 %v1558_v9, %s1491_s11 }
 0x28a   :  { %990 = vrot.lane.b32.xlu1 %v1558_v9, %s1492_s12 }
 0x28f   :  { %657 = vrot.lane.b32.xlu0 %v1558_v9, %s1478_s20  ;;  %s1450_s20 = scalar_lea.vmem %s1130_s19, 256 }
 0x290   :  { %p1451_p1 = scmp.ne.s32.totalorder %s1130_s19, %s1450_s20  ;;  %p1456_p3 = scmp.lt.s32.totalorder %s1450_s20, %s1450_s20 }
 0x292   :  { %p1457_p4 = por %p1456_p3, %p1455_p2 }
 0x294   :  { %p1458_p5 = pnand %p1457_p4, %p1451_p1 }
 0x2bd   :  { %v187_v25 = vpop.xlane.xlu0 %186 }
 0x2be   :  { %v188_v26 = vsub.f32 %v1622_v39, %v187_v25 }
 0x2c0   :  { %v189_v27 = vmul.f32 1.442695, %v188_v26 }
 0x2c1   :  { %v420_v34 = vpop.permute.xlu0 %419 }
 0x2c2   :  { %1358 = vpow2.f32 %v189_v27  ;;  %v425_v37 = vsel %vm201_vm3, %v420_v34, 0 }
 0x2c5   :  { %v299_v28 = vpop.xlane.xlu1 %298 }
 0x2c6   :  { %v300_v29 = vsub.f32 %v1628_v45, %v299_v28 }
 0x2c8   :  { %v301_v30 = vmul.f32 1.442695, %v300_v29 }
 0x2c9   :  { %v531_v41 = vpop.permute.xlu1 %530 }
 0x2ca   :  { %1360 = vpow2.f32 %v301_v30  ;;  %v536_v60 = vsel %vm201_vm3, %v531_v41, 0 }
 0x2cf   :  { %v1359_v31 = vpop.eup %1358 }
 0x2d0   :  { %v195_v32 = vpack.c.bf16 %v1359_v31, %v1359_v31  ;;  %v191_v2 = vsel %vm137_vm2, %v1359_v31, 0.0 }
 0x2d2   :  { %1221 = vmatmul.mubr.msk.bf16.vlgmr.msra.gmra.mxu0 %vm137_vm2, %v195_v32 }
 0x2d3   :  { %1231 = vmatpush3.bf16.msra.mxu0 %v314_v33  ;;  %1232 = vmatprep.mubr.msk.bf16.mxu0 %vm1482_vm0, %v1481_v0 }
 0x2d4   :  { %1242 = vmatprep.subr.bf16.mxu0 %v1481_v0 }
 0x2d7   :  { %v1361_v9 = vpop.eup %1360 }
 0x2d8   :  { %v303_v35 = vsel %vm137_vm2, %v1361_v9, 0.0  ;;  %v307_v36 = vpack.c.bf16 %v1361_v9, %v1361_v9 }
 0x2d9   :  { %304 = vadd.xlane.f32.xlu1 %v303_v35 }
 0x2da   :  { %1233 = vmatmul.mubr.msk.bf16.vlgmr.msra.gmra.mxu0 %vm137_vm2, %v307_v36 }
 0x2db   :  { %1243 = vmatpush3.bf16.msra.mxu0 %v425_v37  ;;  %1244 = vmatprep.mubr.msk.bf16.mxu0 %vm1482_vm0, %v1481_v0 }
 0x2dc   :  { %1254 = vmatprep.subr.bf16.mxu0 %v1481_v0 }
 0x2f2   :  { %v410_v38 = vpop.xlane.xlu0 %409 }
 0x2f3   :  { %v411_v39 = vsub.f32 %v407_v5, %v410_v38 }
 0x2f5   :  { %v412_v40 = vmul.f32 1.442695, %v411_v39 }
 0x2f6   :  { %v521_v42 = vpop.xlane.xlu0 %520 }
 0x2f7   :  { %1362 = vpow2.f32 %v412_v40  ;;  %v522_v43 = vsub.f32 %v518_v7, %v521_v42 }
 0x2f9   :  { %v523_v44 = vmul.f32 1.442695, %v522_v43 }
 0x2fa   :  { %v648_v45 = vpop.xlane.xlu0 %647  ;;  %v759_v46 = vpop.xlane.xlu1 %758 }
 0x2fb   :  { %1364 = vpow2.f32 %v523_v44  ;;  %v760_v47 = vsub.f32 %v756_v15, %v759_v46  ;;  %v649_v48 = vsub.f32 %v645_v14, %v648_v45 }
 0x2fd   :  { %v761_v49 = vmul.f32 1.442695, %v760_v47  ;;  %v650_v52 = vmul.f32 1.442695, %v649_v48 }
 0x2fe   :  { %v870_v50 = vpop.xlane.xlu0 %869  ;;  %v769_v11 = vpop.permute.xlu1 %768 }
 0x2ff   :  { %v871_v51 = vsub.f32 %v867_v20, %v870_v50  ;;  %1366 = vpow2.f32 %v761_v49  ;;  %v774_v14 = vsel %vm201_vm3, %v769_v11, 0 }
 0x301   :  { %v872_v53 = vmul.f32 1.442695, %v871_v51 }
 0x302   :  { %v981_v54 = vpop.xlane.xlu0 %980  ;;  %v880_v16 = vpop.permute.xlu1 %879 }
 0x303   :  { %1368 = vpow2.f32 %v872_v53  ;;  %v982_v55 = vsub.f32 %v978_v22, %v981_v54  ;;  %v885_v18 = vsel %vm201_vm3, %v880_v16, 0  ;;  %v1356_v54 = vld [vmem:[#allocation7 + $0x8] sm:$0xff]  }
 0x304   :  { %v1363_v56 = vpop.eup %1362  ;;  %1370 = vpow2.f32 %v650_v52  ;;  %1309 = vmatpush3.bf16.msra.mxu1 %v1356_v54 }
 0x305   :  { %v983_v57 = vmul.f32 1.442695, %v982_v55  ;;  %v414_v58 = vsel %vm137_vm2, %v1363_v56, 0.0  ;;  %v418_v59 = vpack.c.bf16 %v1363_v56, %v1363_v56  ;;  %1310 = vmatprep.subr.bf16.mxu1 %v1481_v0 }
 0x306   :  { %415 = vadd.xlane.f32.xlu1 %v414_v58  ;;  %v658_v63 = vpop.permute.xlu0 %657  ;;  %v991_v19 = vpop.permute.xlu1 %990 }
 0x307   :  { %1372 = vpow2.f32 %v983_v57  ;;  %1245 = vmatmul.mubr.msk.bf16.vlgmr.msra.gmra.mxu0 %vm137_vm2, %v418_v59  ;;  %v663_v5 = vsel %vm201_vm3, %v658_v63, 0  ;;  %v996_v21 = vsel %vm201_vm3, %v991_v19, 0  ;;  %v1357_v63 = vld [vmem:[#allocation7] sm:$0xff]  }
 0x308   :  { %v1365_v61 = vpop.eup %1364  ;;  %1255 = vmatpush3.bf16.msra.mxu0 %v536_v60  ;;  %1256 = vmatprep.mubr.msk.bf16.mxu0 %vm1482_vm0, %v1481_v0 }
 0x309   :  { %v525_v62 = vsel %vm137_vm2, %v1365_v61, 0.0  ;;  %1266 = vmatprep.subr.bf16.mxu0 %v1481_v0  ;;  %v529_v3 = vpack.c.bf16 %v1365_v61, %v1365_v61  ;;  %1311 = vmatpush3.bf16.msra.mxu1 %v1357_v63 }
 0x30a   :  { %526 = vadd.xlane.f32.xlu1 %v525_v62 }
 0x30c   :  { %v1367_v1 = vpop.eup %1366 }
 0x30d   :  { %v763_v4 = vsel %vm137_vm2, %v1367_v1, 0.0  ;;  %v767_v17 = vpack.c.bf16 %v1367_v1, %v1367_v1 }
 0x30e   :  { %192 = vadd.xlane.f32.xlu1 %v191_v2  ;;  %764 = vadd.xlane.f32.xlu0 %v763_v4 }
 0x30f   :  { %1257 = vmatmul.mubr.msk.bf16.vlgmr.msra.gmra.mxu0 %vm137_vm2, %v529_v3 }
 0x310   :  { %v1369_v6 = vpop.eup %1368  ;;  %1267 = vmatpush3.bf16.msra.mxu0 %v663_v5  ;;  %1268 = vmatprep.mubr.msk.bf16.mxu0 %vm1482_vm0, %v1481_v0 }
 0x311   :  { %v874_v8 = vsel %vm137_vm2, %v1369_v6, 0.0  ;;  %1278 = vmatprep.subr.bf16.mxu0 %v1481_v0  ;;  %v1371_v10 = vpop.eup %1370  ;;  %v878_v20 = vpack.c.bf16 %v1369_v6, %v1369_v6 }
 0x312   :  { %875 = vadd.xlane.f32.xlu0 %v874_v8  ;;  %v656_v13 = vpack.c.bf16 %v1371_v10, %v1371_v10  ;;  %v652_v15 = vsel %vm137_vm2, %v1371_v10, 0.0 }
 0x314   :  { %v1373_v7 = vpop.eup %1372 }
 0x315   :  { %v985_v12 = vsel %vm137_vm2, %v1373_v7, 0.0  ;;  %v989_v22 = vpack.c.bf16 %v1373_v7, %v1373_v7 }
 0x316   :  { %986 = vadd.xlane.f32.xlu0 %v985_v12 }
 0x317   :  { %1269 = vmatmul.mubr.msk.bf16.vlgmr.msra.gmra.mxu0 %vm137_vm2, %v656_v13 }
 0x318   :  { %1279 = vmatpush3.bf16.msra.mxu0 %v774_v14  ;;  %1280 = vmatprep.mubr.msk.bf16.mxu0 %vm1482_vm0, %v1481_v0 }
 0x319   :  { %1290 = vmatprep.subr.bf16.mxu0 %v1481_v0 }
 0x31a   :  { %653 = vadd.xlane.f32.xlu0 %v652_v15 }
 0x31f   :  { %1281 = vmatmul.mubr.msk.bf16.vlgmr.msra.gmra.mxu0 %vm137_vm2, %v767_v17 }
 0x320   :  { %1291 = vmatpush3.bf16.msra.mxu0 %v885_v18  ;;  %1292 = vmatprep.mubr.msk.bf16.mxu0 %vm1482_vm0, %v1481_v0 }
 0x321   :  { %1302 = vmatprep.subr.bf16.mxu0 %v1481_v0 }
 0x327   :  { %1293 = vmatmul.mubr.msk.bf16.vlgmr.msra.gmra.mxu0 %vm137_vm2, %v878_v20 }
 0x328   :  { %1303 = vmatpush3.bf16.msra.mxu0 %v996_v21  ;;  %1304 = vmatprep.mubr.msk.bf16.mxu0 %vm1482_vm0, %v1481_v0 }
 0x32f   :  { %1305 = vmatmul.mubr.msk.bf16.vlgmr.msra.gmra.mxu0 %vm137_vm2, %v989_v22 }
 0x362   :  { %v305_v34 = vpop.xlane.xlu1 %304 }
 0x363   :  { %1374 = vrcp.f32 %v305_v34 }
 0x370   :  { %v1375_v46 = vpop.eup %1374 }
 0x38f   :  { %v416_v40 = vpop.xlane.xlu1 %415 }
 0x392   :  { %v1707_v23 = vpop.f32.mrf.mxu0 }
 0x393   :  { %v527_v47 = vpop.xlane.xlu1 %526 }
 0x394   :  { %v1222_v24 = vpop.f32.mrf.mxu0 }
 0x396   :  { %v242_v25 = vpop.f32.mrf.mxu0 }
 0x397   :  { %v765_v35 = vpop.xlane.xlu0 %764  ;;  %v193_v14 = vpop.xlane.xlu1 %192 }
 0x398   :  { %v1223_v26 = vpop.f32.mrf.mxu0  ;;  %1376 = vrcp.f32 %v765_v35 }
 0x399   :  { %1378 = vrcp.f32 %v416_v40 }
 0x39a   :  { %v350_v27 = vpop.f32.mrf.mxu0 }
 0x39b   :  { %v876_v41 = vpop.xlane.xlu0 %875  ;;  %v356_v51 = vmul.f32 %v1375_v46, %v350_v27 }
 0x39c   :  { %v1234_v28 = vpop.f32.mrf.mxu0  ;;  %1380 = vrcp.f32 %v876_v41 }
 0x39d   :  { %1382 = vrcp.f32 %v527_v47 }
 0x39e   :  { %v353_v29 = vpop.f32.mrf.mxu0 }
 0x39f   :  { %v987_v49 = vpop.xlane.xlu0 %986 }
 0x3a0   :  { %v1235_v30 = vpop.f32.mrf.mxu0  ;;  %1384 = vrcp.f32 %v987_v49 }
 0x3a1   :  { %1386 = vrcp.f32 %v193_v14 }
 0x3a3   :  { %v654_v15 = vpop.xlane.xlu0 %653 }
 0x3a4   :  { %1388 = vrcp.f32 %v654_v15 }
 0x3a5   :  { %v1377_v48 = vpop.eup %1376 }
 0x3a6   :  { %v1379_v58 = vpop.eup %1378 }
 0x3a9   :  { %v1381_v59 = vpop.eup %1380 }
 0x3aa   :  { %v1383_v5 = vpop.eup %1382 }
 0x3ad   :  { %v1385_v6 = vpop.eup %1384 }
 0x3ae   :  { %v1387_v18 = vpop.eup %1386 }
 0x3af   :  { %v245_v26 = vmul.f32 %v1387_v18, %v1707_v23  ;;  %v1162_v23 = vld [vmem:[%s1727_s3] ss:$0 sm:$0xff] }
 0x3b1   :  { %v1389_v21 = vpop.eup %1388 }
 0x3c7   :  { %v461_v31 = vpop.f32.mrf.mxu0 }
 0x3c8   :  { %v467_v61 = vmul.f32 %v1379_v58, %v461_v31 }
 0x3c9   :  { %v1246_v32 = vpop.f32.mrf.mxu0 }
 0x3cb   :  { %v464_v33 = vpop.f32.mrf.mxu0 }
 0x3cd   :  { %v1247_v9 = vpop.f32.mrf.mxu0 }
 0x3cf   :  { %v572_v36 = vpop.f32.mrf.mxu0 }
 0x3d0   :  { %v578_v10 = vmul.f32 %v1383_v5, %v572_v36 }
 0x3d1   :  { %v1258_v37 = vpop.f32.mrf.mxu0 }
 0x3d3   :  { %v575_v38 = vpop.f32.mrf.mxu0 }
 0x3d5   :  { %v1259_v39 = vpop.f32.mrf.mxu0 }
 0x3d7   :  { %v699_v42 = vpop.f32.mrf.mxu0 }
 0x3d8   :  { %v705_v25 = vmul.f32 %v1389_v21, %v699_v42 }
 0x3d9   :  { %v1270_v43 = vpop.f32.mrf.mxu0 }
 0x3db   :  { %v702_v44 = vpop.f32.mrf.mxu0 }
 0x3dd   :  { %v1271_v45 = vpop.f32.mrf.mxu0 }
 0x3df   :  { %v810_v50 = vpop.f32.mrf.mxu0 }
 0x3e0   :  { %v816_v52 = vmul.f32 %v1377_v48, %v810_v50 }
 0x3e1   :  { %v1282_v53 = vpop.f32.mrf.mxu0 }
 0x3e2   :  { %v1338_v55 = vpack.i.bf16 %v816_v52, %v356_v51 }
 0x3e3   :  { %v813_v56 = vpop.f32.mrf.mxu0 }
 0x3e4   :  { %1339 = vrot.lane.b32.xlu1 %v1338_v55, %s1493_s13 }
 0x3e5   :  { %v1283_v57 = vpop.f32.mrf.mxu0 }
 0x3e7   :  { %v921_v60 = vpop.f32.mrf.mxu0 }
 0x3e8   :  { %v927_v62 = vmul.f32 %v1381_v59, %v921_v60 }
 0x3e9   :  { %v1294_v1 = vpop.f32.mrf.mxu0 }
 0x3ea   :  { %v1343_v2 = vpack.i.bf16 %v927_v62, %v467_v61 }
 0x3eb   :  { %v924_v3 = vpop.f32.mrf.mxu0 }
 0x3ec   :  { %1344 = vrot.lane.b32.xlu0 %v1343_v2, %s1494_s14 }
 0x3ed   :  { %v1295_v4 = vpop.f32.mrf.mxu0 }
 0x3ef   :  { %v1032_v8 = vpop.f32.mrf.mxu0 }
 0x3f0   :  { %v1038_v7 = vmul.f32 %v1385_v6, %v1032_v8 }
 0x3f1   :  { %v1306_v0 = vpop.f32.mrf.mxu0 }
 0x3f2   :  { %v1348_v11 = vpack.i.bf16 %v1038_v7, %v578_v10 }
 0x3f3   :  { %v1035_v12 = vpop.f32.mrf.mxu0 }
 0x3f4   :  { %1349 = vrot.lane.b32.xlu1 %v1348_v11, %s1495_s15 }
 0x3f5   :  { %v1307_v13 = vpop.f32.mrf.mxu0 }
 0x456   :  { %v1340_v16 = vpop.permute.xlu1 %1339 }
 0x457   :  { %v1342_v19 = vunpack.i.h.bf16 %v1340_v16  ;;  %v1341_v20 = vunpack.i.l.bf16 %v1340_v16 }
 0x459   :  { %v1051_v28 = vsel %vm137_vm2, %v705_v25, %v1342_v19  ;;  %v591_v29 = vsel %vm137_vm2, %v245_v26, %v1341_v20 }
 0x45e   :  { %v1345_v17 = vpop.permute.xlu0 %1344 }
 0x45f   :  { %v1347_v22 = vunpack.i.h.bf16 %v1345_v17  ;;  %v1346_v24 = vunpack.i.l.bf16 %v1345_v17 }
 0x461   :  { %v1052_v32 = vsel %vm592_vm5, %v1051_v28, %v1347_v22  ;;  %v593_v33 = vsel %vm592_vm5, %v591_v29, %v1346_v24 }
 0x466   :  { %v1350_v27 = vpop.permute.xlu1 %1349 }
 0x467   :  { %v1352_v30 = vunpack.i.h.bf16 %v1350_v27  ;;  %v1351_v31 = vunpack.i.l.bf16 %v1350_v27 }
 0x469   :  { %v1053_v9 = vsel %vm594_vm6, %v1052_v32, %v1352_v30  ;;  %v595_v34 = vsel %vm594_vm6, %v593_v33, %v1351_v31 }
 0x46a   :  { %v1054_v35 = vpack.c.bf16 %v1053_v9, %v595_v34 }
 0x46c   :  { %1313 = vmatmul.mubr.msk.bf16.vlgmr.msra.gmra.mxu1 %vm83_vm1, %v1054_v35 }
 0x52c   :  { %v1115_v36 = vpop.f32.mrf.mxu1 }
 0x52d   :  { %v1116_v37 = vadd.f32 %v1162_v23, %v1115_v36 }
 0x52e   :  { %v1314_v38 = vpop.f32.mrf.mxu1 }
 0x52f   :  { %1122 = vst.msk [vmem:[#allocation8] sm:$0xff] %vm83_vm1, %v1116_v37 }
 0x530   :  { %v1118_v39 = vpop.f32.mrf.mxu1 }
 0x531   :  { %v1119_v40 = vadd.f32 %v1162_v23, %v1118_v39 }
 0x532   :  { %v1315_v41 = vpop.f32.mrf.mxu1 }
 0x533   :  { %1123 = vst.msk [vmem:[#allocation8 + $0x8] sm:$0xff] %vm83_vm1, %v1119_v40 }
 0x534   :  { %1461 = shalt.err (!%p1458_p5)
}
 0x535   :  { %s1497_s3 = smov 128  }
 0x536   :  { %1135 = dma.vmem_to_hbm [thread:$0]  %s1130_s19, 256, %s1728_s4, [#allocation4], %s1497_s3, %s1497_s3, %s1493_s13  }
 0x537   :  { %1474 = dma.done.wait [#allocation4], 256  }
 0x538   :  { %1475 = vsyncadd [#allocation4], 4294967040 }
 0x539   :  { %1139 = vsyncpa [#allocation3], 1 }
 0x53a   :  { %1140 = vsyncpa [#allocation6], 1 }
 0x53b   :  { %1141 = vsyncpa [#allocation4], 1 }

</bundles_post_ra>
